<compile_context>
chip_gen: v7x
topology: tpu7x:2x2x1
jax: 0.10.0
libtpu: 0.0.40
codegen_flags: <defaults>
</compile_context>

<pallas_src>
import math
import functools

import jax
import jax.numpy as jnp
from jax.experimental import pallas as pl
from jax.experimental.pallas import tpu as pltpu


def _round_up(x, m):
    return ((x + m - 1) // m) * m


# ----------------------- support = X @ W -----------------------------------

def _support_kernel(x_ref, w_ref, s_ref):
    s_ref[...] = jnp.dot(x_ref[...], w_ref[...],
                         preferred_element_type=jnp.float32)


def _compute_support(x_p, w_p, tm):
    n_p, in_p = x_p.shape
    out_p = w_p.shape[1]
    cost = pl.CostEstimate(
        flops=2 * n_p * in_p * out_p,
        transcendentals=0,
        bytes_accessed=4 * (n_p * in_p + in_p * out_p + n_p * out_p),
    )
    return pl.pallas_call(
        _support_kernel,
        out_shape=jax.ShapeDtypeStruct((n_p, out_p), jnp.float32),
        grid_spec=pltpu.PrefetchScalarGridSpec(
            num_scalar_prefetch=0,
            grid=(n_p // tm,),
            in_specs=[
                pl.BlockSpec((tm, in_p), lambda i: (i, 0)),
                pl.BlockSpec((in_p, out_p), lambda i: (0, 0)),
            ],
            out_specs=pl.BlockSpec((tm, out_p), lambda i: (i, 0)),
        ),
        compiler_params=pltpu.CompilerParams(
            dimension_semantics=("parallel",)),
        cost_estimate=cost,
    )(x_p, w_p)


# ----------------------- output = A @ support + bias ------------------------

def _aggregate_kernel(adj_ref, s_ref, b_ref, o_ref, acc_ref):
    k = pl.program_id(1)

    @pl.when(k == 0)
    def _():
        acc_ref[...] = jnp.zeros_like(acc_ref)

    acc_ref[...] += jnp.dot(adj_ref[...], s_ref[...],
                            preferred_element_type=jnp.float32)

    @pl.when(k == pl.num_programs(1) - 1)
    def _():
        # Bias added only once, in the epilogue of the k-reduction.
        o_ref[...] = (acc_ref[...] + b_ref[...]).astype(o_ref.dtype)


@functools.partial(jax.jit, static_argnames=("use_bf16_adj",))
def gcn_layer(x, weight, adj, bias=None, *, use_bf16_adj=False):
    """x: (N, in_f), weight: (in_f, out_f), adj: (N, N) dense, bias: (out_f,)."""
    n, in_f = x.shape
    out_f = weight.shape[1]

    # Lane / MXU alignment.
    in_p = _round_up(in_f, 128)
    out_p = _round_up(out_f, 128)

    # MXU-aligned adjacency tiles (TM rows of output, TK reduction cols).
    if n <= 128:
        tm, tk = 128, 128
    elif n <= 512:
        tm, tk = 128, 256
    else:
        tm, tk = 256, 512
    n_p = _round_up(n, tk)  # tk is a multiple of tm, so tm | n_p as well.

    # Zero-padding keeps the math exact; padded rows are sliced off at the end.
    x_p = jnp.zeros((n_p, in_p), jnp.float32).at[:n, :in_f].set(x)
    w_p = jnp.zeros((in_p, out_p), jnp.float32).at[:in_f, :out_f].set(weight)
    adj_p = jnp.zeros((n_p, n_p), jnp.float32).at[:n, :n].set(adj)
    b_p = jnp.zeros((1, out_p), jnp.float32)
    if bias is not None:
        b_p = b_p.at[0, :out_f].set(bias)

    # support computed once; only n_p * out_p * 4 bytes, stays resident.
    support = _compute_support(x_p, w_p, tm)

    if use_bf16_adj:
        # Halves adjacency HBM traffic on v6e/v7x; f32 accumulation retained.
        adj_p = adj_p.astype(jnp.bfloat16)
        support = support.astype(jnp.bfloat16)

    item = jnp.dtype(adj_p.dtype).itemsize
    cost = pl.CostEstimate(
        flops=2 * n_p * n_p * out_p,
        transcendentals=0,
        bytes_accessed=n_p * n_p * item + n_p * out_p * item
        + 4 * (n_p * out_p + out_p),
    )

    y_p = pl.pallas_call(
        _aggregate_kernel,
        out_shape=jax.ShapeDtypeStruct((n_p, out_p), jnp.float32),
        grid_spec=pltpu.PrefetchScalarGridSpec(
            num_scalar_prefetch=0,
            grid=(n_p // tm, n_p // tk),
            in_specs=[
                pl.BlockSpec((tm, tk), lambda i, k: (i, k)),        # adj stream
                pl.BlockSpec((tk, out_p), lambda i, k: (k, 0)),     # support
                pl.BlockSpec((1, out_p), lambda i, k: (0, 0)),      # bias (resident)
            ],
            out_specs=pl.BlockSpec((tm, out_p), lambda i, k: (i, 0)),
            scratch_shapes=[pltpu.VMEM((tm, out_p), jnp.float32)],  # f32 accumulator
        ),
        compiler_params=pltpu.CompilerParams(
            dimension_semantics=("parallel", "arbitrary"),
            vmem_limit_bytes=48 * 1024 * 1024,
        ),
        cost_estimate=cost,
    )(adj_p, support, b_p)

    return y_p[:n, :out_f]


if __name__ == "__main__":
    # Small shapes consistent with the module: N nodes, in/out feature dims.
    N = 64
    in_features = 32
    out_features = 16

    key = jax.random.PRNGKey(0)
    k_x, k_adj, k_w, k_b = jax.random.split(key, 4)

    # Node features.
    x = jax.random.normal(k_x, (N, in_features), dtype=jnp.float32)

    # Row-normalized dense adjacency with self-loops (deterministic, synthetic).
    adj_raw = (jax.random.uniform(k_adj, (N, N)) > 0.8).astype(jnp.float32)
    adj_raw = adj_raw + jnp.eye(N, dtype=jnp.float32)
    deg = jnp.sum(adj_raw, axis=1, keepdims=True)
    adj = adj_raw / deg

    # Parameter init matching reset_parameters(): uniform(-stdv, stdv),
    # stdv = 1/sqrt(out_features).
    stdv = 1.0 / math.sqrt(out_features)
    weight = jax.random.uniform(
        k_w, (in_features, out_features), minval=-stdv, maxval=stdv,
        dtype=jnp.float32)
    bias = jax.random.uniform(
        k_b, (out_features,), minval=-stdv, maxval=stdv, dtype=jnp.float32)

    out = gcn_layer(x, weight, adj, bias)
    out = jax.block_until_ready(out)

    # Reference check in plain JAX.
    ref = adj @ (x @ weight) + bias[None, :]
    assert out.shape == (N, out_features)
    assert jnp.allclose(out, ref, atol=1e-4, rtol=1e-4)

    print("KERNEL_OK")
</pallas_src>

<mosaic_0001>
module attributes {stable_mosaic.version = 11 : i64} {
  func.func @_support_kernel(%arg0: i32, %arg1: memref<128x128xf32, #tpu.memory_space<vmem>>, %arg2: memref<128x128xf32, #tpu.memory_space<vmem>>, %arg3: memref<128x128xf32, #tpu.memory_space<vmem>>) attributes {dimension_semantics = [#tpu.dimension_semantics<parallel>], iteration_bounds = array<i64: 1>, scalar_prefetch = 0 : i64, scratch_operands = 0 : i64, tpu.core_type = #tpu.core_type<tc>, window_params = [{transform_indices = @transform_0, window_bounds = array<i64: 128, 128>}, {pipeline_mode = #tpu.pipeline_mode<synchronous>, transform_indices = @transform_1, window_bounds = array<i64: 128, 128>}, {transform_indices = @transform_2, window_bounds = array<i64: 128, 128>}]} {
    %c0 = arith.constant 0 : index
    %c0_0 = arith.constant 0 : index
    %0 = vector.load %arg1[%c0, %c0_0] : memref<128x128xf32, #tpu.memory_space<vmem>>, vector<128x128xf32>
    %c0_1 = arith.constant 0 : index
    %c0_2 = arith.constant 0 : index
    %1 = vector.load %arg2[%c0_1, %c0_2] : memref<128x128xf32, #tpu.memory_space<vmem>>, vector<128x128xf32>
    %cst = arith.constant dense<0.000000e+00> : vector<128x128xf32>
    %2 = tpu.matmul %0, %1, %cst {dimension_numbers = #tpu.dot_dimension_numbers<[1], [0], [0], [1], [0, 0, 1, 1], [], []>} : vector<128x128xf32>, vector<128x128xf32>, vector<128x128xf32> -> vector<128x128xf32>
    %c0_3 = arith.constant 0 : index
    %c0_4 = arith.constant 0 : index
    %3 = vector.load %arg3[%c0_3, %c0_4] : memref<128x128xf32, #tpu.memory_space<vmem>>, vector<128x128xf32>
    tpu.vector_store %arg3[%c0_3, %c0_4], %2 {strides = array<i32>} : memref<128x128xf32, #tpu.memory_space<vmem>>, vector<128x128xf32>,
    return
  }
  func.func @transform_0(%arg0: i32) -> (i32, i32) {
    %c0_i32 = arith.constant 0 : i32
    %c0_i32_0 = arith.constant 0 : i32
    return %arg0, %c0_i32 : i32, i32
  }
  func.func @transform_1(%arg0: i32) -> (i32, i32) {
    %c0_i32 = arith.constant 0 : i32
    %c0_i32_0 = arith.constant 0 : i32
    %c0_i32_1 = arith.constant 0 : i32
    return %c0_i32, %c0_i32_0 : i32, i32
  }
  func.func @transform_2(%arg0: i32) -> (i32, i32) {
    %c0_i32 = arith.constant 0 : i32
    %c0_i32_0 = arith.constant 0 : i32
    return %arg0, %c0_i32 : i32, i32
  }
}

module attributes {stable_mosaic.version = 11 : i64} {
  func.func @_aggregate_kernel(%arg0: i32, %arg1: i32, %arg2: memref<128x128xf32, #tpu.memory_space<vmem>>, %arg3: memref<128x128xf32, #tpu.memory_space<vmem>>, %arg4: memref<1x128xf32, #tpu.memory_space<vmem>>, %arg5: memref<128x128xf32, #tpu.memory_space<vmem>>, %arg6: memref<128x128xf32, #tpu.memory_space<vmem>>) attributes {dimension_semantics = [#tpu.dimension_semantics<parallel>, #tpu.dimension_semantics<arbitrary>], iteration_bounds = array<i64: 1, 1>, scalar_prefetch = 0 : i64, scratch_operands = 1 : i64, tpu.core_type = #tpu.core_type<tc>, window_params = [{transform_indices = @transform_0, window_bounds = array<i64: 128, 128>}, {transform_indices = @transform_1, window_bounds = array<i64: 128, 128>}, {pipeline_mode = #tpu.pipeline_mode<synchronous>, transform_indices = @transform_2, window_bounds = array<i64: 1, 128>}, {transform_indices = @transform_3, window_bounds = array<i64: 128, 128>}]} {
    %c0_i32 = arith.constant 0 : i32
    %0 = arith.cmpi eq, %arg1, %c0_i32 : i32
    %1 = arith.extui %0 : i1 to i32
    %c0_i32_0 = arith.constant 0 : i32
    %2 = arith.cmpi ne, %1, %c0_i32_0 : i32
    scf.if %2 {
      %cst_10 = arith.constant 0.000000e+00 : f32
      %12 = vector.broadcast %cst_10 : f32 to vector<128x128xf32>
      %c0_11 = arith.constant 0 : index
      %c0_12 = arith.constant 0 : index
      %13 = vector.load %arg6[%c0_11, %c0_12] : memref<128x128xf32, #tpu.memory_space<vmem>>, vector<128x128xf32>
      tpu.vector_store %arg6[%c0_11, %c0_12], %12 {strides = array<i32>} : memref<128x128xf32, #tpu.memory_space<vmem>>, vector<128x128xf32>,
    } else {
    }
    %c0 = arith.constant 0 : index
    %c0_1 = arith.constant 0 : index
    %3 = vector.load %arg6[%c0, %c0_1] : memref<128x128xf32, #tpu.memory_space<vmem>>, vector<128x128xf32>
    %c0_2 = arith.constant 0 : index
    %c0_3 = arith.constant 0 : index
    %4 = vector.load %arg2[%c0_2, %c0_3] : memref<128x128xf32, #tpu.memory_space<vmem>>, vector<128x128xf32>
    %c0_4 = arith.constant 0 : index
    %c0_5 = arith.constant 0 : index
    %5 = vector.load %arg3[%c0_4, %c0_5] : memref<128x128xf32, #tpu.memory_space<vmem>>, vector<128x128xf32>
    %cst = arith.constant dense<0.000000e+00> : vector<128x128xf32>
    %6 = tpu.matmul %4, %5, %cst {dimension_numbers = #tpu.dot_dimension_numbers<[1], [0], [0], [1], [0, 0, 1, 1], [], []>} : vector<128x128xf32>, vector<128x128xf32>, vector<128x128xf32> -> vector<128x128xf32>
    %7 = arith.addf %3, %6 : vector<128x128xf32>
    %c0_6 = arith.constant 0 : index
    %c0_7 = arith.constant 0 : index
    %8 = vector.load %arg6[%c0_6, %c0_7] : memref<128x128xf32, #tpu.memory_space<vmem>>, vector<128x128xf32>
    tpu.vector_store %arg6[%c0_6, %c0_7], %7 {strides = array<i32>} : memref<128x128xf32, #tpu.memory_space<vmem>>, vector<128x128xf32>,
    %c0_i32_8 = arith.constant 0 : i32
    %9 = arith.cmpi eq, %arg1, %c0_i32_8 : i32
    %10 = arith.extui %9 : i1 to i32
    %c0_i32_9 = arith.constant 0 : i32
    %11 = arith.cmpi ne, %10, %c0_i32_9 : i32
    scf.if %11 {
      %c0_10 = arith.constant 0 : index
      %c0_11 = arith.constant 0 : index
      %12 = vector.load %arg6[%c0_10, %c0_11] : memref<128x128xf32, #tpu.memory_space<vmem>>, vector<128x128xf32>
      %c0_12 = arith.constant 0 : index
      %c0_13 = arith.constant 0 : index
      %13 = vector.load %arg4[%c0_12, %c0_13] : memref<1x128xf32, #tpu.memory_space<vmem>>, vector<1x128xf32>
      %14 = vector.broadcast %13 : vector<1x128xf32> to vector<128x128xf32>
      %15 = arith.addf %12, %14 : vector<128x128xf32>
      %c0_14 = arith.constant 0 : index
      %c0_15 = arith.constant 0 : index
      %16 = vector.load %arg5[%c0_14, %c0_15] : memref<128x128xf32, #tpu.memory_space<vmem>>, vector<128x128xf32>
      tpu.vector_store %arg5[%c0_14, %c0_15], %15 {strides = array<i32>} : memref<128x128xf32, #tpu.memory_space<vmem>>, vector<128x128xf32>,
    } else {
    }
    return
  }
  func.func @transform_0(%arg0: i32, %arg1: i32) -> (i32, i32) {
    %c0_i32 = arith.constant 0 : i32
    return %arg0, %arg1 : i32, i32
  }
  func.func @transform_1(%arg0: i32, %arg1: i32) -> (i32, i32) {
    %c0_i32 = arith.constant 0 : i32
    %c0_i32_0 = arith.constant 0 : i32
    return %arg1, %c0_i32 : i32, i32
  }
  func.func @transform_2(%arg0: i32, %arg1: i32) -> (i32, i32) {
    %c0_i32 = arith.constant 0 : i32
    %c0_i32_0 = arith.constant 0 : i32
    %c0_i32_1 = arith.constant 0 : i32
    return %c0_i32, %c0_i32_0 : i32, i32
  }
  func.func @transform_3(%arg0: i32, %arg1: i32) -> (i32, i32) {
    %c0_i32 = arith.constant 0 : i32
    %c0_i32_0 = arith.constant 0 : i32
    return %arg0, %c0_i32 : i32, i32
  }
}

</mosaic_0001>

<bundles_post_ra>
// kernel: gcn_layer.2
= control target key start
LH: loop header
LB: loop body
LE: loop exit
PB: predicated region body
PF: predicated region fallthrough
CT: control target
= control target key end

     0   :  { %s503_s1 = inlined_call_operand.vmem [shape: f32[128,128], index: 1, kind: input, shape index: {}]   ;;  %s504_s0 = inlined_call_operand.vmem [shape: f32[128,128], index: 0, kind: input, shape index: {}]   ;;  %s505_s2 = inlined_call_operand.vmem [shape: f32[128,128], index: 2, kind: output, shape index: {}]  }
   0x1   :  { %v27_v0 = vld [vmem:[%s503_s1] sm:$0xff]  ;;  %v28_v1 = vld [vmem:[%s503_s1 + $0x8] sm:$0xff]  ;;  %v29_v2 = vld [vmem:[%s503_s1 + $0x10] sm:$0xff] }
   0x2   :  { %v296_v3 = vpack.c.bf16 %v28_v1, %v27_v0  ;;  %v30_v4 = vld [vmem:[%s503_s1 + $0x18] sm:$0xff]  ;;  %v31_v6 = vld [vmem:[%s503_s1 + $0x20] sm:$0xff]  ;;  %v32_v7 = vld [vmem:[%s503_s1 + $0x28] sm:$0xff] }
   0x3   :  { %v300_v5 = vpack.c.bf16 %v30_v4, %v29_v2  ;;  %v304_v8 = vpack.c.bf16 %v32_v7, %v31_v6  ;;  %v11_v9 = vld [vmem:[%s504_s0] sm:$0xff]  ;;  %v33_v11 = vld [vmem:[%s503_s1 + $0x30] sm:$0xff]  ;;  %v34_v12 = vld [vmem:[%s503_s1 + $0x38] sm:$0xff] }
   0x4   :  { %297 = vmatprep.subr.bf16.mxu0 %v296_v3  ;;  %328 = vmatprep.subr.bf16.mxu1 %v296_v3  ;;  %v19_v10 = vld [vmem:[%s504_s0 + $0x40] sm:$0xff]  ;;  %v308_v13 = vpack.c.bf16 %v34_v12, %v33_v11  ;;  %v36_v15 = vld [vmem:[%s503_s1 + $0x48] sm:$0xff]  ;;  %v37_v17 = vld [vmem:[%s503_s1 + $0x50] sm:$0xff] }
   0x5   :  { %299 = vmatpush3.bf16.msra.mxu0 %v296_v3  ;;  %336 = vmatpush3.bf16.msra.mxu1 %v296_v3  ;;  %v35_v14 = vld [vmem:[%s503_s1 + $0x40] sm:$0xff]  ;;  %v38_v18 = vld [vmem:[%s503_s1 + $0x58] sm:$0xff]  ;;  %v40_v21 = vld [vmem:[%s503_s1 + $0x68] sm:$0xff] }
   0x6   :  { %301 = vmatprep.subr.bf16.mxu0 %v300_v5  ;;  %329 = vmatprep.subr.bf16.mxu1 %v300_v5  ;;  %v312_v16 = vpack.c.bf16 %v36_v15, %v35_v14  ;;  %v316_v19 = vpack.c.bf16 %v38_v18, %v37_v17  ;;  %v39_v20 = vld [vmem:[%s503_s1 + $0x60] sm:$0xff]  ;;  %v41_v23 = vld [vmem:[%s503_s1 + $0x70] sm:$0xff]  ;;  %v42_v24 = vld [vmem:[%s503_s1 + $0x78] sm:$0xff] }
   0x7   :  { %272 = vmatprep.mubr.f32.mxu0 %v11_v9  ;;  %284 = vmatprep.mubr.f32.mxu1 %v19_v10  ;;  %v320_v22 = vpack.c.bf16 %v40_v21, %v39_v20  ;;  %v324_v25 = vpack.c.bf16 %v42_v24, %v41_v23  ;;  %v12_v26 = vld [vmem:[%s504_s0 + $0x8] sm:$0xff]  ;;  %v13_v28 = vld [vmem:[%s504_s0 + $0x10] sm:$0xff]  ;;  %v14_v30 = vld [vmem:[%s504_s0 + $0x18] sm:$0xff] }
   0x8   :  { %v20_v27 = vld [vmem:[%s504_s0 + $0x48] sm:$0xff]  ;;  %v21_v29 = vld [vmem:[%s504_s0 + $0x50] sm:$0xff]  ;;  %v22_v31 = vld [vmem:[%s504_s0 + $0x58] sm:$0xff] }
   0x9   :  { %303 = vmatpush3.bf16.msra.mxu0 %v300_v5  ;;  %337 = vmatpush3.bf16.msra.mxu1 %v300_v5  ;;  %v15_v32 = vld [vmem:[%s504_s0 + $0x20] sm:$0xff]  ;;  %v16_v34 = vld [vmem:[%s504_s0 + $0x28] sm:$0xff]  ;;  %v17_v36 = vld [vmem:[%s504_s0 + $0x30] sm:$0xff] }
   0xa   :  { %305 = vmatprep.subr.bf16.mxu0 %v304_v8  ;;  %330 = vmatprep.subr.bf16.mxu1 %v304_v8  ;;  %v23_v33 = vld [vmem:[%s504_s0 + $0x60] sm:$0xff]  ;;  %v24_v35 = vld [vmem:[%s504_s0 + $0x68] sm:$0xff]  ;;  %v25_v37 = vld [vmem:[%s504_s0 + $0x70] sm:$0xff] }
   0xb   :  { %v18_v38 = vld [vmem:[%s504_s0 + $0x38] sm:$0xff] }
   0xc   :  { %v26_v39 = vld [vmem:[%s504_s0 + $0x78] sm:$0xff] }
   0xd   :  { %307 = vmatpush3.bf16.msra.mxu0 %v304_v8  ;;  %338 = vmatpush3.bf16.msra.mxu1 %v304_v8 }
   0xe   :  { %309 = vmatprep.subr.bf16.mxu0 %v308_v13  ;;  %331 = vmatprep.subr.bf16.mxu1 %v308_v13 }
  0x11   :  { %311 = vmatpush3.bf16.msra.mxu0 %v308_v13  ;;  %339 = vmatpush3.bf16.msra.mxu1 %v308_v13 }
  0x12   :  { %313 = vmatprep.subr.bf16.mxu0 %v312_v16  ;;  %332 = vmatprep.subr.bf16.mxu1 %v312_v16 }
  0x15   :  { %315 = vmatpush3.bf16.msra.mxu0 %v312_v16  ;;  %340 = vmatpush3.bf16.msra.mxu1 %v312_v16 }
  0x16   :  { %317 = vmatprep.subr.bf16.mxu0 %v316_v19  ;;  %333 = vmatprep.subr.bf16.mxu1 %v316_v19 }
  0x19   :  { %319 = vmatpush3.bf16.msra.mxu0 %v316_v19  ;;  %341 = vmatpush3.bf16.msra.mxu1 %v316_v19 }
  0x1a   :  { %321 = vmatprep.subr.bf16.mxu0 %v320_v22  ;;  %334 = vmatprep.subr.bf16.mxu1 %v320_v22 }
  0x1d   :  { %323 = vmatpush3.bf16.msra.mxu0 %v320_v22  ;;  %342 = vmatpush3.bf16.msra.mxu1 %v320_v22 }
  0x1e   :  { %325 = vmatprep.subr.bf16.mxu0 %v324_v25  ;;  %335 = vmatprep.subr.bf16.mxu1 %v324_v25 }
  0x21   :  { %327 = vmatpush3.bf16.msra.mxu0 %v324_v25  ;;  %343 = vmatpush3.bf16.msra.mxu1 %v324_v25 }
  0x24   :  { %273 = vmatmul.mubr.f32.vlgmr.msra.gmra.mrb[0].mxu0 %v12_v26  ;;  %285 = vmatmul.mubr.f32.vlgmr.msra.gmra.mrb[0].mxu1 %v20_v27 }
  0x25   :  { %275 = vmatprep.mubr.f32.mxu0 %v13_v28  ;;  %287 = vmatprep.mubr.f32.mxu1 %v21_v29 }
  0x28   :  { %276 = vmatmul.mubr.f32.gmra.mrb[2].mxu0 %v14_v30  ;;  %288 = vmatmul.mubr.f32.gmra.mrb[2].mxu1 %v22_v31 }
  0x29   :  { %278 = vmatprep.mubr.f32.mxu0 %v15_v32  ;;  %290 = vmatprep.mubr.f32.mxu1 %v23_v33 }
  0x2c   :  { %279 = vmatmul.mubr.f32.gmra.mrb[4].mxu0 %v16_v34  ;;  %291 = vmatmul.mubr.f32.gmra.mrb[4].mxu1 %v24_v35 }
  0x2d   :  { %281 = vmatprep.mubr.f32.mxu0 %v17_v36  ;;  %293 = vmatprep.mubr.f32.mxu1 %v25_v37 }
  0x30   :  { %282 = vmatmul.mubr.f32.gmra.mrb[6].mxu0 %v18_v38  ;;  %294 = vmatmul.mubr.f32.gmra.mrb[6].mxu1 %v26_v39 }
  0xf7   :  { %v274_v40 = vpop.f32.mrb[0].mxu0  ;;  %v286_v41 = vpop.f32.mrb[0].mxu1 }
  0xf8   :  { %189 = vst [vmem:[%s505_s2 + $0x8] sm:$0xff] %v274_v40  ;;  %197 = vst [vmem:[%s505_s2 + $0x48] sm:$0xff] %v286_v41  ;;  %v109_v42 = vpop.f32.mrb[1].mxu0  ;;  %v149_v43 = vpop.f32.mrb[1].mxu1 }
  0xf9   :  { %188 = vst [vmem:[%s505_s2] sm:$0xff] %v109_v42  ;;  %196 = vst [vmem:[%s505_s2 + $0x40] sm:$0xff] %v149_v43 }
  0xfb   :  { %v277_v44 = vpop.f32.mrb[2].mxu0  ;;  %v289_v45 = vpop.f32.mrb[2].mxu1 }
  0xfc   :  { %191 = vst [vmem:[%s505_s2 + $0x18] sm:$0xff] %v277_v44  ;;  %199 = vst [vmem:[%s505_s2 + $0x58] sm:$0xff] %v289_v45  ;;  %v119_v46 = vpop.f32.mrb[3].mxu0  ;;  %v159_v47 = vpop.f32.mrb[3].mxu1 }
  0xfd   :  { %190 = vst [vmem:[%s505_s2 + $0x10] sm:$0xff] %v119_v46  ;;  %198 = vst [vmem:[%s505_s2 + $0x50] sm:$0xff] %v159_v47 }
  0xff   :  { %v280_v48 = vpop.f32.mrb[4].mxu0  ;;  %v292_v49 = vpop.f32.mrb[4].mxu1 }
 0x100   :  { %193 = vst [vmem:[%s505_s2 + $0x28] sm:$0xff] %v280_v48  ;;  %201 = vst [vmem:[%s505_s2 + $0x68] sm:$0xff] %v292_v49  ;;  %v129_v50 = vpop.f32.mrb[5].mxu0  ;;  %v169_v51 = vpop.f32.mrb[5].mxu1 }
 0x101   :  { %192 = vst [vmem:[%s505_s2 + $0x20] sm:$0xff] %v129_v50  ;;  %200 = vst [vmem:[%s505_s2 + $0x60] sm:$0xff] %v169_v51 }
 0x103   :  { %v283_v52 = vpop.f32.mrb[6].mxu0  ;;  %v295_v53 = vpop.f32.mrb[6].mxu1 }
 0x104   :  { %195 = vst [vmem:[%s505_s2 + $0x38] sm:$0xff] %v283_v52  ;;  %203 = vst [vmem:[%s505_s2 + $0x78] sm:$0xff] %v295_v53  ;;  %v139_v54 = vpop.f32.mrb[7].mxu0  ;;  %v179_v55 = vpop.f32.mrb[7].mxu1 }
 0x105   :  { %194 = vst [vmem:[%s505_s2 + $0x30] sm:$0xff] %v139_v54  ;;  %202 = vst [vmem:[%s505_s2 + $0x70] sm:$0xff] %v179_v55 }

// kernel: gcn_layer.3
= control target key start
LH: loop header
LB: loop body
LE: loop exit
PB: predicated region body
PF: predicated region fallthrough
CT: control target
= control target key end

     0   :  { %s625_s1 = inlined_call_operand.vmem [shape: f32[128,128], index: 1, kind: input, shape index: {}]   ;;  %s626_s0 = inlined_call_operand.vmem [shape: f32[128,128], index: 0, kind: input, shape index: {}]   ;;  %s627_s2 = inlined_call_operand.vmem [shape: f32[1,128], index: 2, kind: input, shape index: {}]   ;;  %s628_s3 = inlined_call_operand.vmem [shape: f32[128,128], index: 3, kind: output, shape index: {}]  }
   0x1   :  { %v66_v0 = vld [vmem:[%s625_s1] sm:$0xff]  ;;  %v67_v1 = vld [vmem:[%s625_s1 + $0x8] sm:$0xff]  ;;  %v68_v2 = vld [vmem:[%s625_s1 + $0x10] sm:$0xff] }
   0x2   :  { %v410_v3 = vpack.c.bf16 %v67_v1, %v66_v0  ;;  %v69_v4 = vld [vmem:[%s625_s1 + $0x18] sm:$0xff]  ;;  %v70_v6 = vld [vmem:[%s625_s1 + $0x20] sm:$0xff]  ;;  %v71_v7 = vld [vmem:[%s625_s1 + $0x28] sm:$0xff] }
   0x3   :  { %v414_v5 = vpack.c.bf16 %v69_v4, %v68_v2  ;;  %v418_v8 = vpack.c.bf16 %v71_v7, %v70_v6  ;;  %v50_v9 = vld [vmem:[%s626_s0] sm:$0xff]  ;;  %v72_v11 = vld [vmem:[%s625_s1 + $0x30] sm:$0xff]  ;;  %v73_v12 = vld [vmem:[%s625_s1 + $0x38] sm:$0xff] }
   0x4   :  { %411 = vmatprep.subr.bf16.mxu0 %v410_v3  ;;  %442 = vmatprep.subr.bf16.mxu1 %v410_v3  ;;  %v58_v10 = vld [vmem:[%s626_s0 + $0x40] sm:$0xff]  ;;  %v422_v13 = vpack.c.bf16 %v73_v12, %v72_v11  ;;  %v75_v15 = vld [vmem:[%s625_s1 + $0x48] sm:$0xff]  ;;  %v76_v17 = vld [vmem:[%s625_s1 + $0x50] sm:$0xff] }
   0x5   :  { %413 = vmatpush3.bf16.msra.mxu0 %v410_v3  ;;  %450 = vmatpush3.bf16.msra.mxu1 %v410_v3  ;;  %v74_v14 = vld [vmem:[%s625_s1 + $0x40] sm:$0xff]  ;;  %v77_v18 = vld [vmem:[%s625_s1 + $0x58] sm:$0xff]  ;;  %v79_v21 = vld [vmem:[%s625_s1 + $0x68] sm:$0xff] }
   0x6   :  { %415 = vmatprep.subr.bf16.mxu0 %v414_v5  ;;  %443 = vmatprep.subr.bf16.mxu1 %v414_v5  ;;  %v426_v16 = vpack.c.bf16 %v75_v15, %v74_v14  ;;  %v430_v19 = vpack.c.bf16 %v77_v18, %v76_v17  ;;  %v78_v20 = vld [vmem:[%s625_s1 + $0x60] sm:$0xff]  ;;  %v80_v23 = vld [vmem:[%s625_s1 + $0x70] sm:$0xff]  ;;  %v81_v24 = vld [vmem:[%s625_s1 + $0x78] sm:$0xff] }
   0x7   :  { %386 = vmatprep.mubr.f32.mxu0 %v50_v9  ;;  %398 = vmatprep.mubr.f32.mxu1 %v58_v10  ;;  %v434_v22 = vpack.c.bf16 %v79_v21, %v78_v20  ;;  %v438_v25 = vpack.c.bf16 %v81_v24, %v80_v23  ;;  %v51_v26 = vld [vmem:[%s626_s0 + $0x8] sm:$0xff]  ;;  %v52_v28 = vld [vmem:[%s626_s0 + $0x10] sm:$0xff]  ;;  %v53_v30 = vld [vmem:[%s626_s0 + $0x18] sm:$0xff] }
   0x8   :  { %v59_v27 = vld [vmem:[%s626_s0 + $0x48] sm:$0xff]  ;;  %v60_v29 = vld [vmem:[%s626_s0 + $0x50] sm:$0xff]  ;;  %v61_v31 = vld [vmem:[%s626_s0 + $0x58] sm:$0xff] }
   0x9   :  { %417 = vmatpush3.bf16.msra.mxu0 %v414_v5  ;;  %451 = vmatpush3.bf16.msra.mxu1 %v414_v5  ;;  %v54_v32 = vld [vmem:[%s626_s0 + $0x20] sm:$0xff]  ;;  %v55_v34 = vld [vmem:[%s626_s0 + $0x28] sm:$0xff]  ;;  %v56_v36 = vld [vmem:[%s626_s0 + $0x30] sm:$0xff] }
   0xa   :  { %419 = vmatprep.subr.bf16.mxu0 %v418_v8  ;;  %444 = vmatprep.subr.bf16.mxu1 %v418_v8  ;;  %v62_v33 = vld [vmem:[%s626_s0 + $0x60] sm:$0xff]  ;;  %v63_v35 = vld [vmem:[%s626_s0 + $0x68] sm:$0xff]  ;;  %v64_v37 = vld [vmem:[%s626_s0 + $0x70] sm:$0xff] }
   0xb   :  { %v57_v38 = vld [vmem:[%s626_s0 + $0x38] sm:$0xff]  ;;  %v321_v40 = vld [vmem:[%s627_s2] ss:$0 sm:$0xff] }
   0xc   :  { %v65_v39 = vld [vmem:[%s626_s0 + $0x78] sm:$0xff] }
   0xd   :  { %421 = vmatpush3.bf16.msra.mxu0 %v418_v8  ;;  %452 = vmatpush3.bf16.msra.mxu1 %v418_v8 }
   0xe   :  { %423 = vmatprep.subr.bf16.mxu0 %v422_v13  ;;  %445 = vmatprep.subr.bf16.mxu1 %v422_v13 }
  0x11   :  { %425 = vmatpush3.bf16.msra.mxu0 %v422_v13  ;;  %453 = vmatpush3.bf16.msra.mxu1 %v422_v13 }
  0x12   :  { %427 = vmatprep.subr.bf16.mxu0 %v426_v16  ;;  %446 = vmatprep.subr.bf16.mxu1 %v426_v16 }
  0x15   :  { %429 = vmatpush3.bf16.msra.mxu0 %v426_v16  ;;  %454 = vmatpush3.bf16.msra.mxu1 %v426_v16 }
  0x16   :  { %431 = vmatprep.subr.bf16.mxu0 %v430_v19  ;;  %447 = vmatprep.subr.bf16.mxu1 %v430_v19 }
  0x19   :  { %433 = vmatpush3.bf16.msra.mxu0 %v430_v19  ;;  %455 = vmatpush3.bf16.msra.mxu1 %v430_v19 }
  0x1a   :  { %435 = vmatprep.subr.bf16.mxu0 %v434_v22  ;;  %448 = vmatprep.subr.bf16.mxu1 %v434_v22 }
  0x1d   :  { %437 = vmatpush3.bf16.msra.mxu0 %v434_v22  ;;  %456 = vmatpush3.bf16.msra.mxu1 %v434_v22 }
  0x1e   :  { %439 = vmatprep.subr.bf16.mxu0 %v438_v25  ;;  %449 = vmatprep.subr.bf16.mxu1 %v438_v25 }
  0x21   :  { %441 = vmatpush3.bf16.msra.mxu0 %v438_v25  ;;  %457 = vmatpush3.bf16.msra.mxu1 %v438_v25 }
  0x24   :  { %387 = vmatmul.mubr.f32.vlgmr.msra.gmra.mrb[0].mxu0 %v51_v26  ;;  %399 = vmatmul.mubr.f32.vlgmr.msra.gmra.mrb[0].mxu1 %v59_v27 }
  0x25   :  { %389 = vmatprep.mubr.f32.mxu0 %v52_v28  ;;  %401 = vmatprep.mubr.f32.mxu1 %v60_v29 }
  0x28   :  { %390 = vmatmul.mubr.f32.gmra.mrb[2].mxu0 %v53_v30  ;;  %402 = vmatmul.mubr.f32.gmra.mrb[2].mxu1 %v61_v31 }
  0x29   :  { %392 = vmatprep.mubr.f32.mxu0 %v54_v32  ;;  %404 = vmatprep.mubr.f32.mxu1 %v62_v33 }
  0x2c   :  { %393 = vmatmul.mubr.f32.gmra.mrb[4].mxu0 %v55_v34  ;;  %405 = vmatmul.mubr.f32.gmra.mrb[4].mxu1 %v63_v35 }
  0x2d   :  { %395 = vmatprep.mubr.f32.mxu0 %v56_v36  ;;  %407 = vmatprep.mubr.f32.mxu1 %v64_v37 }
  0x30   :  { %396 = vmatmul.mubr.f32.gmra.mrb[6].mxu0 %v57_v38  ;;  %408 = vmatmul.mubr.f32.gmra.mrb[6].mxu1 %v65_v39 }
  0xf7   :  { %v388_v41 = vpop.f32.mrb[0].mxu0  ;;  %v400_v42 = vpop.f32.mrb[0].mxu1 }
  0xf8   :  { %v286_v43 = vadd.f32 %v388_v41, %v321_v40  ;;  %v294_v44 = vadd.f32 %v400_v42, %v321_v40  ;;  %v148_v45 = vpop.f32.mrb[1].mxu0  ;;  %v188_v46 = vpop.f32.mrb[1].mxu1 }
  0xf9   :  { %v285_v47 = vadd.f32 %v321_v40, %v148_v45  ;;  %v293_v48 = vadd.f32 %v321_v40, %v188_v46 }
  0xfa   :  { %302 = vst [vmem:[%s628_s3 + $0x8] sm:$0xff] %v286_v43  ;;  %310 = vst [vmem:[%s628_s3 + $0x48] sm:$0xff] %v294_v44 }
  0xfb   :  { %301 = vst [vmem:[%s628_s3] sm:$0xff] %v285_v47  ;;  %309 = vst [vmem:[%s628_s3 + $0x40] sm:$0xff] %v293_v48  ;;  %v391_v49 = vpop.f32.mrb[2].mxu0  ;;  %v403_v50 = vpop.f32.mrb[2].mxu1 }
  0xfc   :  { %v288_v51 = vadd.f32 %v391_v49, %v321_v40  ;;  %v296_v52 = vadd.f32 %v403_v50, %v321_v40  ;;  %v158_v53 = vpop.f32.mrb[3].mxu0  ;;  %v198_v54 = vpop.f32.mrb[3].mxu1 }
  0xfd   :  { %v287_v55 = vadd.f32 %v321_v40, %v158_v53  ;;  %v295_v56 = vadd.f32 %v321_v40, %v198_v54 }
  0xfe   :  { %304 = vst [vmem:[%s628_s3 + $0x18] sm:$0xff] %v288_v51  ;;  %312 = vst [vmem:[%s628_s3 + $0x58] sm:$0xff] %v296_v52 }
  0xff   :  { %303 = vst [vmem:[%s628_s3 + $0x10] sm:$0xff] %v287_v55  ;;  %311 = vst [vmem:[%s628_s3 + $0x50] sm:$0xff] %v295_v56  ;;  %v394_v57 = vpop.f32.mrb[4].mxu0  ;;  %v406_v58 = vpop.f32.mrb[4].mxu1 }
 0x100   :  { %v290_v59 = vadd.f32 %v394_v57, %v321_v40  ;;  %v298_v60 = vadd.f32 %v406_v58, %v321_v40  ;;  %v168_v61 = vpop.f32.mrb[5].mxu0  ;;  %v208_v62 = vpop.f32.mrb[5].mxu1 }
 0x101   :  { %v289_v63 = vadd.f32 %v321_v40, %v168_v61  ;;  %v297_v0 = vadd.f32 %v321_v40, %v208_v62 }
 0x102   :  { %306 = vst [vmem:[%s628_s3 + $0x28] sm:$0xff] %v290_v59  ;;  %314 = vst [vmem:[%s628_s3 + $0x68] sm:$0xff] %v298_v60 }
 0x103   :  { %305 = vst [vmem:[%s628_s3 + $0x20] sm:$0xff] %v289_v63  ;;  %313 = vst [vmem:[%s628_s3 + $0x60] sm:$0xff] %v297_v0  ;;  %v397_v1 = vpop.f32.mrb[6].mxu0  ;;  %v409_v2 = vpop.f32.mrb[6].mxu1 }
 0x104   :  { %v292_v3 = vadd.f32 %v397_v1, %v321_v40  ;;  %v300_v4 = vadd.f32 %v409_v2, %v321_v40  ;;  %v178_v5 = vpop.f32.mrb[7].mxu0  ;;  %v218_v6 = vpop.f32.mrb[7].mxu1 }
 0x105   :  { %v291_v7 = vadd.f32 %v321_v40, %v178_v5  ;;  %v299_v8 = vadd.f32 %v321_v40, %v218_v6 }
 0x106   :  { %308 = vst [vmem:[%s628_s3 + $0x38] sm:$0xff] %v292_v3  ;;  %316 = vst [vmem:[%s628_s3 + $0x78] sm:$0xff] %v300_v4 }
 0x107   :  { %307 = vst [vmem:[%s628_s3 + $0x30] sm:$0xff] %v291_v7  ;;  %315 = vst [vmem:[%s628_s3 + $0x70] sm:$0xff] %v299_v8 }

</bundles_post_ra>
